<compile_context>
chip_gen: v7x
topology: tpu7x:2x2x1
jax: 0.10.0
libtpu: 0.0.40
codegen_flags: <defaults>
</compile_context>

<pallas_src>
import jax
import jax.numpy as jnp
from jax.experimental import pallas as pl
from jax.experimental.pallas import tpu as pltpu


def _affine_kernel(w_ref, b_ref, x_ref, o_ref):
    # w_ref / b_ref: (1,) float32 scalars in SMEM.
    # x_ref / o_ref: (tile_rows, lanes) VMEM tiles.
    # NOTE: the last grid step may be a partial block; out-of-range elements
    # are read, transformed and then discarded by the masked store.  That is
    # benign for this purely elementwise op -- do NOT add a reduction over the
    # tile without first masking those elements.
    x = x_ref[...]
    if jnp.issubdtype(x_ref.dtype, jnp.floating):
        w = w_ref[0].astype(x.dtype)
        b = b_ref[0].astype(x.dtype)
        o_ref[...] = x * w + b
    else:
        # Integer / exotic dtypes: compute in f32, cast back (truncates).
        o_ref[...] = (x.astype(jnp.float32) * w_ref[0] + b_ref[0]).astype(o_ref.dtype)


def _round_up(a, m):
    return (a + m - 1) // m * m


def _vmem_capacity_bytes():
    """Best-effort physical VMEM size of the attached TPU (bytes)."""
    try:
        info = pltpu.get_tpu_info()
        cap = getattr(info, "vmem_capacity_bytes", None)
        if cap:
            return int(cap)
    except Exception:
        pass
    try:
        kind = jax.devices()[0].device_kind.lower()
        if "v5" in kind or "v6" in kind:
            return 128 * 1024 * 1024
    except Exception:
        pass
    return 64 * 1024 * 1024  # conservative (v7x-sized) default


def _tiling_config(vmem_bytes):
    """Return (tile_bytes, vmem_limit_bytes) for this TPU generation."""
    if vmem_bytes >= 100 * 1024 * 1024:
        # v5e / v6e: 128 MiB VMEM.  Footprint = 4 * tile (in+out, dbl-buffered)
        # = 48 MiB, comfortably inside the 64 MiB scoped limit we request.
        return 12 * 1024 * 1024, 64 * 1024 * 1024
    # v7x: 64 MiB VMEM.  Footprint = 32 MiB inside a 48 MiB scoped limit.
    return 8 * 1024 * 1024, 48 * 1024 * 1024


def linear_model2_forward(x, w, b):
    """y = w * x + b with scalar w and b, arbitrary input shape/dtype."""
    orig_shape = x.shape
    orig_dtype = x.dtype
    n = x.size

    if n == 0:
        return jnp.zeros(orig_shape, dtype=orig_dtype)

    # Widest lane-dense last dim (multiple of 128) that needs no padding copy.
    lanes = None
    for cand in (1024, 512, 256, 128):
        if n % cand == 0:
            lanes = cand
            break
    if lanes is None:
        # Ragged size: pad + kernel + slice would do ~3x the HBM traffic of a
        # single fused XLA pass, so fall back to plain XLA for this case.
        if jnp.issubdtype(orig_dtype, jnp.floating):
            return x * w[0].astype(orig_dtype) + b[0].astype(orig_dtype)
        return (x.astype(jnp.float32) * w[0] + b[0]).astype(orig_dtype)

    rows = n // lanes
    x2d = x.reshape(rows, lanes)

    itemsize = jnp.dtype(orig_dtype).itemsize
    # Packed-sublane multiple: 8 for 4-byte, 16 for 2-byte, 32 for 1-byte dtypes.
    sub_mult = max(8, 32 // max(1, itemsize))

    tile_bytes, vmem_limit = _tiling_config(_vmem_capacity_bytes())
    slab_bytes = rows * lanes * itemsize

    SMALL_SLAB_BYTES = 2 * 1024 * 1024
    MIN_STEPS = 4  # keep >=4 grid steps for non-tiny slabs (v7x megacore + pipelining)
    if slab_bytes <= SMALL_SLAB_BYTES or rows <= sub_mult:
        tile_rows = rows  # tiny slab: single full-extent block
    else:
        budget_rows = max(sub_mult,
                          (tile_bytes // (lanes * itemsize)) // sub_mult * sub_mult)
        min_step_rows = max(sub_mult, _round_up(pl.cdiv(rows, MIN_STEPS), sub_mult))
        tile_rows = min(budget_rows, min_step_rows, rows)

    grid = (pl.cdiv(rows, tile_rows),)

    out2d = pl.pallas_call(
        _affine_kernel,
        out_shape=jax.ShapeDtypeStruct((rows, lanes), orig_dtype),
        grid=grid,
        in_specs=[
            pl.BlockSpec(memory_space=pltpu.SMEM),               # w (f32 scalar)
            pl.BlockSpec(memory_space=pltpu.SMEM),               # b (f32 scalar)
            pl.BlockSpec((tile_rows, lanes), lambda i: (i, 0)),   # x row-tile
        ],
        out_specs=pl.BlockSpec((tile_rows, lanes), lambda i: (i, 0)),
        compiler_params=pltpu.CompilerParams(
            dimension_semantics=("parallel",),
            vmem_limit_bytes=vmem_limit,
        ),
        cost_estimate=pl.CostEstimate(
            flops=2 * n, transcendentals=0, bytes_accessed=2 * n * itemsize),
    )(
        w.astype(jnp.float32).reshape(1),
        b.astype(jnp.float32).reshape(1),
        x2d,
    )

    return out2d.reshape(orig_shape)


if __name__ == "__main__":
    key = jax.random.PRNGKey(0)
    k_w, k_x = jax.random.split(key)

    # Parameters (mirrors nn.Parameter(torch.randn(1)) / torch.zeros(1)).
    w = jax.random.normal(k_w, (1,), dtype=jnp.float32)
    b = jnp.zeros((1,), dtype=jnp.float32)

    # Small NCHW-like input: batch=2, channels=4, spatial=16x16.
    x = jax.random.normal(k_x, (2, 4, 16, 16), dtype=jnp.float32)

    y = linear_model2_forward(x, w, b)
    jax.block_until_ready(y)

    # Sanity check against plain JAX reference.
    y_ref = w[0] * x + b[0]
    assert y.shape == x.shape
    assert y.dtype == x.dtype
    assert jnp.allclose(y, y_ref, atol=1e-6), "mismatch vs reference"

    print("KERNEL_OK")
</pallas_src>

<mosaic_0001>
module attributes {stable_mosaic.version = 11 : i64} {
  func.func @_affine_kernel(%arg0: i32, %arg1: memref<1xf32, #tpu.memory_space<smem>>, %arg2: memref<1xf32, #tpu.memory_space<smem>>, %arg3: memref<2x1024xf32, #tpu.memory_space<vmem>>, %arg4: memref<2x1024xf32, #tpu.memory_space<vmem>>) attributes {dimension_semantics = [#tpu.dimension_semantics<parallel>], iteration_bounds = array<i64: 1>, scalar_prefetch = 0 : i64, scratch_operands = 0 : i64, tpu.core_type = #tpu.core_type<tc>, window_params = [{transform_indices = @transform_0, window_bounds = array<i64: 1>}, {transform_indices = @transform_1, window_bounds = array<i64: 1>}, {transform_indices = @transform_2, window_bounds = array<i64: 2, 1024>}, {transform_indices = @transform_3, window_bounds = array<i64: 2, 1024>}]} {
    %c0 = arith.constant 0 : index
    %c0_0 = arith.constant 0 : index
    %0 = vector.load %arg3[%c0, %c0_0] : memref<2x1024xf32, #tpu.memory_space<vmem>>, vector<2x1024xf32>
    %c0_1 = arith.constant 0 : index
    %1 = memref.load %arg1[%c0_1] : memref<1xf32, #tpu.memory_space<smem>>
    %c0_2 = arith.constant 0 : index
    %2 = memref.load %arg2[%c0_2] : memref<1xf32, #tpu.memory_space<smem>>
    %3 = vector.broadcast %1 : f32 to vector<2x1024xf32>
    %4 = arith.mulf %0, %3 : vector<2x1024xf32>
    %5 = vector.broadcast %2 : f32 to vector<2x1024xf32>
    %6 = arith.addf %4, %5 : vector<2x1024xf32>
    %c0_3 = arith.constant 0 : index
    %c0_4 = arith.constant 0 : index
    %7 = vector.load %arg4[%c0_3, %c0_4] : memref<2x1024xf32, #tpu.memory_space<vmem>>, vector<2x1024xf32>
    tpu.vector_store %arg4[%c0_3, %c0_4], %6 {strides = array<i32>} : memref<2x1024xf32, #tpu.memory_space<vmem>>, vector<2x1024xf32>,
    return
  }
  func.func @transform_0(%arg0: i32) -> i32 {
    %c0_i32 = arith.constant 0 : i32
    %c0_i32_0 = arith.constant 0 : i32
    return %c0_i32 : i32
  }
  func.func @transform_1(%arg0: i32) -> i32 {
    %c0_i32 = arith.constant 0 : i32
    %c0_i32_0 = arith.constant 0 : i32
    return %c0_i32 : i32
  }
  func.func @transform_2(%arg0: i32) -> (i32, i32) {
    %c0_i32 = arith.constant 0 : i32
    %c0_i32_0 = arith.constant 0 : i32
    return %arg0, %c0_i32 : i32, i32
  }
  func.func @transform_3(%arg0: i32) -> (i32, i32) {
    %c0_i32 = arith.constant 0 : i32
    %c0_i32_0 = arith.constant 0 : i32
    return %arg0, %c0_i32 : i32, i32
  }
}

</mosaic_0001>

<bundles_post_ra>
// kernel: tpu_custom_call.1
= control target key start
LH: loop header
LB: loop body
LE: loop exit
PB: predicated region body
PF: predicated region fallthrough
CT: control target
= control target key end

     0   :  { %10 = vsyncpa [#allocation5], 0  ;;  %s158_s0 = inlined_call_operand.<no memory space> [shape: f32[1], index: 0, kind: input, shape index: {}]   ;;  %s159_s1 = inlined_call_operand.<no memory space> [shape: f32[1], index: 1, kind: input, shape index: {}]   ;;  %s160_s2 = inlined_call_operand.hbm [shape: f32[2,1024], index: 2, kind: input, shape index: {}]   ;;  %s161_s3 = inlined_call_operand.hbm [shape: f32[2,1024], index: 3, kind: output, shape index: {}]  }
   0x1   :  { %11 = vsyncpa [#allocation6], 0  ;;  %s106_s12 = smov [#allocation4]   ;;  %s58_s16 = scalar_lea.hbm %s160_s2, 256 }
   0x2   :  { %s22_s13 = sshll.u32 %s106_s12, 4  ;;  %p59_p0 = scmp.ne.s32.totalorder %s160_s2, %s58_s16  ;;  %s23_s13 = int_to_ptr.vmem [resolvable:$true] %s22_s13 }
   0x3   :  { %p62_p1 = scmp.lt.u32.totalorder %s58_s16, %s160_s2 }
   0x5   :  { %p64_p2 = pnand %p62_p1, %p59_p0 }
   0x7   :  { %67 = shalt.err (!%p64_p2)
}
   0x8   :  { %s68_s21 = scalar_lea.vmem %s23_s13, 256  ;;  %p73_p4 = scmp.lt.s32.totalorder %s23_s13, %s23_s13 }
   0x9   :  { %p69_p3 = scmp.ne.s32.totalorder %s23_s13, %s68_s21  ;;  %p74_p5 = scmp.lt.s32.totalorder %s68_s21, %s68_s21 }
   0xb   :  { %p75_p6 = por %p74_p5, %p73_p4 }
   0xd   :  { %p76_p7 = pnand %p75_p6, %p69_p3 }
   0xf   :  { %79 = shalt.err (!%p76_p7)
}
  0x10   :  { %25 = dma.hbm_to_vmem [thread:$0]  %s160_s2, 256, %s23_s13, [#allocation5]  }
  0x11   :  { %102 = dma.done.wait [#allocation5], 256  }
  0x12   :  { %103 = vsyncadd [#allocation5], 4294967040  ;;  %v33_v0 = vstv %s158_s0  ;;  %v29_v1 = vld [vmem:[#allocation4] sm:$0xff]  ;;  %v36_v2 = vstv %s159_s1  ;;  %v30_v3 = vld [vmem:[#allocation4 + $0x8] sm:$0xff]  ;;  %s107_s28 = smov [#allocation7]  }
  0x13   :  { %s47_s29 = sshll.u32 %s107_s28, 4  ;;  %v34_v4 = vmul.f32 %v33_v0, %v29_v1  ;;  %v35_v5 = vmul.f32 %v33_v0, %v30_v3  ;;  %s48_s29 = int_to_ptr.vmem [resolvable:$true] %s47_s29 }
  0x14   :  { %s80_s2 = scalar_lea.vmem %s48_s29, 256  ;;  %p85_p9 = scmp.lt.s32.totalorder %s48_s29, %s48_s29 }
  0x15   :  { %v37_v6 = vadd.f32 %v36_v2, %v34_v4  ;;  %v38_v7 = vadd.f32 %v36_v2, %v35_v5  ;;  %p81_p8 = scmp.ne.s32.totalorder %s48_s29, %s80_s2  ;;  %p86_p10 = scmp.lt.s32.totalorder %s80_s2, %s80_s2 }
  0x17   :  { %39 = vst [vmem:[#allocation7] sm:$0xff] %v37_v6  ;;  %40 = vst [vmem:[#allocation7 + $0x8] sm:$0xff] %v38_v7  ;;  %p87_p11 = por %p86_p10, %p85_p9 }
  0x19   :  { %p88_p12 = pnand %p87_p11, %p81_p8 }
  0x1b   :  { %91 = shalt.err (!%p88_p12)
}
  0x1c   :  { %s92_s1 = scalar_lea.hbm %s161_s3, 256 }
  0x1d   :  { %p93_p13 = scmp.ne.s32.totalorder %s161_s3, %s92_s1  ;;  %p96_p0 = scmp.lt.u32.totalorder %s92_s1, %s161_s3 }
  0x1f   :  { %p98_p1 = pnand %p96_p0, %p93_p13 }
  0x21   :  { %101 = shalt.err (!%p98_p1)
}
  0x22   :  { %50 = dma.vmem_to_hbm [thread:$0]  %s48_s29, 256, %s161_s3, [#allocation6]  }
  0x23   :  { %104 = dma.done.wait [#allocation6], 256  }
  0x24   :  { %105 = vsyncadd [#allocation6], 4294967040 }
  0x25   :  { %54 = vsyncpa [#allocation5], 1 }
  0x26   :  { %55 = vsyncpa [#allocation6], 1 }

</bundles_post_ra>
